<compile_context>
chip_gen: v7x
topology: tpu7x:2x2x1
jax: 0.10.0
libtpu: 0.0.40
codegen_flags: <defaults>
</compile_context>

<pallas_src>
import jax
import jax.numpy as jnp
from jax.experimental import pallas as pl
from jax.experimental.pallas import tpu as pltpu

# ---- small, module-consistent shapes -------------------------------------
B = 2           # batch
S = 8           # seq_len
V = 20          # word vocab size
D = 16          # word embedding dim
H = 32          # WordSequence hidden dim
L = 6           # data.label_alphabet_size before "+= 2"
NTAG = L + 2    # tag-score width produced by hidden2tag
K = 8           # num_ne: number of inner (nested-entity) classes
BIAS = 1.0      # data.bias


# ---------------------------------------------------------------------------
# Fused SeqLabel.forward kernel (one grid step == one batch row)
# ---------------------------------------------------------------------------
def _seqlabel_kernel(emb_ref, mask_ref, wf_ref, bf_ref, wt1_ref, bt1_ref,
                     uall_ref, wif_ref, wip_ref, bint_ref, wt2t_ref, bt2c_ref,
                     tag2_ref, pred_ref):
    e = emb_ref[0]                                   # (S, D)
    m_col = mask_ref[0]                              # (S, 1) int32

    # WordSequence feature extractor (simplified): tanh(emb @ W + b)
    f = jnp.tanh(jnp.dot(e, wf_ref[...], preferred_element_type=jnp.float32)
                 + bf_ref[...])                      # (S, H)

    # decode_outermost #1 (non-CRF).  log_softmax dropped: argmax(scores) ==
    # argmax(log_softmax(scores)).  First-max tie break matches torch.max.
    s1 = jnp.dot(f, wt1_ref[...], preferred_element_type=jnp.float32) + bt1_ref[...]
    lab1 = jax.lax.broadcasted_iota(jnp.int32, s1.shape, 1)
    ismax1 = s1 >= jnp.max(s1, axis=1, keepdims=True)
    tag1 = jnp.min(jnp.where(ismax1, lab1, NTAG), axis=1, keepdims=True)   # (S,1)

    # correct_predict (BIO first-token fixup), done in-kernel.
    tag1 = tag1 * m_col
    tag1 = jnp.where(tag1 == 0, 1, tag1)
    row = jax.lax.broadcasted_iota(jnp.int32, tag1.shape, 0)
    fix = (row == 0) & (tag1 > 0) & ((tag1 & 1) == 0)
    tag1 = jnp.where(fix, tag1 + 1, tag1)

    # entity_to_graph surrogate (see TODO in wrapper): graph[i,j] = BIAS*ent[i]*ent[j].
    # The graph only feeds the rest of the forward through its row-mean (it is
    # k-uniform, so it cannot change the inner argmax), so only that is formed.
    ent = ((tag1 > 1) & (m_col > 0)).astype(jnp.float32)          # (S, 1)
    esum = jnp.sum(ent, axis=0, keepdims=True)                    # (1, 1)
    gmean = (BIAS / S) * ent * esum                               # (S, 1)

    # extract_inner: biaffine scoring; K first matmuls fused into one wide push.
    t_all = jnp.dot(f, uall_ref[...], preferred_element_type=jnp.float32)  # (S, K*H)
    wp = wip_ref[...]                                             # (K, H)

    best = None
    best_idx = None
    pooled_cols = []
    for k in range(K):                                            # static unroll
        t_k = t_all[:, k * H:(k + 1) * H]                         # (S, H) static slice
        # s_k[i, j] = f_i^T U_k f_j
        s_k = jax.lax.dot_general(t_k, f, (((1,), (1,)), ((), ())),
                                  preferred_element_type=jnp.float32)   # (S, S)
        if k == 0:
            best = s_k
            best_idx = jnp.zeros((S, S), jnp.int32)
        else:
            upd = s_k > best
            best = jnp.where(upd, s_k, best)
            best_idx = jnp.where(upd, k, best_idx)
        pooled_cols.append(jnp.mean(s_k, axis=1, keepdims=True))  # (S, 1)

    # pooled[:, k] = mean_j(inner score_k[:, j]); one MXU push for the mix,
    # and the k-uniform graph-mean term hoisted out of the loop.
    pooled = jnp.concatenate(pooled_cols, axis=1)                 # (S, K)
    wp_sum = jnp.sum(wp, axis=0, keepdims=True)                   # (1, H)
    acc_p = (jnp.dot(pooled, wp, preferred_element_type=jnp.float32)
             + gmean * wp_sum)                                    # (S, H)

    # interactions (simplified): mix features with pooled graph evidence.
    f2 = jnp.tanh(jnp.dot(f, wif_ref[...], preferred_element_type=jnp.float32)
                  + acc_p + bint_ref[...])                        # (S, H)

    # decode_outermost #2, computed label-major so the tag comes out lane-dense.
    s2t = jax.lax.dot_general(wt2t_ref[...], f2, (((1,), (1,)), ((), ())),
                              preferred_element_type=jnp.float32) + bt2c_ref[...]
    lab2 = jax.lax.broadcasted_iota(jnp.int32, s2t.shape, 0)
    ismax2 = s2t >= jnp.max(s2t, axis=0, keepdims=True)
    tag2_ref[0] = jnp.min(jnp.where(ismax2, lab2, NTAG), axis=0, keepdims=True)

    pred_ref[0] = best_idx                                        # (S, S)


# ---------------------------------------------------------------------------
# SeqLabel.forward
# ---------------------------------------------------------------------------
def seqlabel_forward(params, word_inputs, mask):
    bsz, seq_len = word_inputs.shape

    # TODO(synk): original WordSequence (char CNN/LSTM + word LSTM) not shown;
    # a deterministic embedding lookup + tanh projection stands in for it.
    emb = params["emb"][word_inputs]                         # (B, S, D) gather
    mask_c = mask.astype(jnp.int32)[:, :, None]              # (B, S, 1)

    # Pre-shape weights so the kernel sees MXU-friendly layouts:
    #   u_all[h, k*H + h2] == u_inner[k, h, h2]  ->  f @ u_all == all K first matmuls
    u_all = jnp.transpose(params["u_inner"], (1, 0, 2)).reshape(H, K * H)
    w_tag2_t = params["w_tag2"].T                            # (NTAG, H)
    b_tag2_c = params["b_tag2"].T                            # (NTAG, 1)

    tag2, pred_inner = pl.pallas_call(
        _seqlabel_kernel,
        grid=(bsz,),
        out_shape=(jax.ShapeDtypeStruct((bsz, 1, seq_len), jnp.int32),
                   jax.ShapeDtypeStruct((bsz, seq_len, seq_len), jnp.int32)),
        in_specs=[
            pl.BlockSpec((1, S, D), lambda b: (b, 0, 0)),     # emb
            pl.BlockSpec((1, S, 1), lambda b: (b, 0, 0)),     # mask (column)
            pl.BlockSpec((D, H), lambda b: (0, 0)),           # w_feat
            pl.BlockSpec((1, H), lambda b: (0, 0)),           # b_feat
            pl.BlockSpec((H, NTAG), lambda b: (0, 0)),        # w_tag1
            pl.BlockSpec((1, NTAG), lambda b: (0, 0)),        # b_tag1
            pl.BlockSpec((H, K * H), lambda b: (0, 0)),       # u_all (wide biaffine)
            pl.BlockSpec((H, H), lambda b: (0, 0)),           # w_int_f
            pl.BlockSpec((K, H), lambda b: (0, 0)),           # w_int_p
            pl.BlockSpec((1, H), lambda b: (0, 0)),           # b_int
            pl.BlockSpec((NTAG, H), lambda b: (0, 0)),        # w_tag2 (transposed)
            pl.BlockSpec((NTAG, 1), lambda b: (0, 0)),        # b_tag2 (column)
        ],
        out_specs=(pl.BlockSpec((1, 1, S), lambda b: (b, 0, 0)),
                   pl.BlockSpec((1, S, S), lambda b: (b, 0, 0))),
        compiler_params=pltpu.CompilerParams(
            dimension_semantics=("parallel",)),
    )(emb, mask_c, params["w_feat"], params["b_feat"],
      params["w_tag1"], params["b_tag1"], u_all,
      params["w_int_f"], params["w_int_p"], params["b_int"],
      w_tag2_t, b_tag2_c)

    # TODO(synk): entity_to_graph decodes BIO spans with a data-dependent
    # python loop; a tag-co-occurrence surrogate adjacency (row-mean computed
    # inside the kernel) is used instead.
    return tag2[:, 0, :], pred_inner                         # (B,S), (B,S,S)


# ---------------------------------------------------------------------------
# Deterministic parameter init (synthetic, not a checkpoint load)
# ---------------------------------------------------------------------------
def init_params(key):
    ks = jax.random.split(key, 8)
    sc = 0.1
    f32 = jnp.float32
    return {
        "emb":     jax.random.normal(ks[0], (V, D), f32) * sc,
        "w_feat":  jax.random.normal(ks[1], (D, H), f32) * sc,
        "b_feat":  jnp.zeros((1, H), f32),
        "w_tag1":  jax.random.normal(ks[2], (H, NTAG), f32) * sc,
        "b_tag1":  jnp.zeros((1, NTAG), f32),
        "u_inner": jax.random.normal(ks[3], (K, H, H), f32) * sc,
        "w_int_f": jax.random.normal(ks[4], (H, H), f32) * sc,
        "w_int_p": jax.random.normal(ks[5], (K, H), f32) * sc,
        "b_int":   jnp.zeros((1, H), f32),
        "w_tag2":  jax.random.normal(ks[6], (H, NTAG), f32) * sc,
        "b_tag2":  jnp.zeros((1, NTAG), f32),
    }


if __name__ == "__main__":
    key = jax.random.PRNGKey(0)
    pkey, wkey = jax.random.split(key)
    params = init_params(pkey)

    word_inputs = jax.random.randint(wkey, (B, S), 0, V, dtype=jnp.int32)
    lengths = jnp.array([S, S - 3], jnp.int32)
    mask = (jnp.arange(S)[None, :] < lengths[:, None]).astype(jnp.int32)

    fwd = jax.jit(seqlabel_forward)
    tag_seq, pred_inner = fwd(params, word_inputs, mask)
    jax.block_until_ready((tag_seq, pred_inner))

    assert tag_seq.shape == (B, S) and tag_seq.dtype == jnp.int32
    assert pred_inner.shape == (B, S, S) and pred_inner.dtype == jnp.int32
    print("KERNEL_OK")
</pallas_src>

<mosaic_0001>
module attributes {stable_mosaic.version = 11 : i64} {
  func.func @_seqlabel_kernel(%arg0: i32, %arg1: memref<1x8x16xf32, #tpu.memory_space<vmem>>, %arg2: memref<1x8x1xi32, #tpu.memory_space<vmem>>, %arg3: memref<16x32xf32, #tpu.memory_space<vmem>>, %arg4: memref<1x32xf32, #tpu.memory_space<vmem>>, %arg5: memref<32x8xf32, #tpu.memory_space<vmem>>, %arg6: memref<1x8xf32, #tpu.memory_space<vmem>>, %arg7: memref<32x256xf32, #tpu.memory_space<vmem>>, %arg8: memref<32x32xf32, #tpu.memory_space<vmem>>, %arg9: memref<8x32xf32, #tpu.memory_space<vmem>>, %arg10: memref<1x32xf32, #tpu.memory_space<vmem>>, %arg11: memref<8x32xf32, #tpu.memory_space<vmem>>, %arg12: memref<8x1xf32, #tpu.memory_space<vmem>>, %arg13: memref<1x1x8xi32, #tpu.memory_space<vmem>>, %arg14: memref<1x8x8xi32, #tpu.memory_space<vmem>>) attributes {dimension_semantics = [#tpu.dimension_semantics<parallel>], iteration_bounds = array<i64: 2>, scalar_prefetch = 0 : i64, scratch_operands = 0 : i64, tpu.core_type = #tpu.core_type<tc>, window_params = [{transform_indices = @transform_0, window_bounds = array<i64: 1, 8, 16>}, {transform_indices = @transform_1, window_bounds = array<i64: 1, 8, 1>}, {pipeline_mode = #tpu.pipeline_mode<synchronous>, transform_indices = @transform_2, window_bounds = array<i64: 16, 32>}, {pipeline_mode = #tpu.pipeline_mode<synchronous>, transform_indices = @transform_3, window_bounds = array<i64: 1, 32>}, {pipeline_mode = #tpu.pipeline_mode<synchronous>, transform_indices = @transform_4, window_bounds = array<i64: 32, 8>}, {pipeline_mode = #tpu.pipeline_mode<synchronous>, transform_indices = @transform_5, window_bounds = array<i64: 1, 8>}, {pipeline_mode = #tpu.pipeline_mode<synchronous>, transform_indices = @transform_6, window_bounds = array<i64: 32, 256>}, {pipeline_mode = #tpu.pipeline_mode<synchronous>, transform_indices = @transform_7, window_bounds = array<i64: 32, 32>}, {pipeline_mode = #tpu.pipeline_mode<synchronous>, transform_indices = @transform_8, window_bounds = array<i64: 8, 32>}, {pipeline_mode = #tpu.pipeline_mode<synchronous>, transform_indices = @transform_9, window_bounds = array<i64: 1, 32>}, {pipeline_mode = #tpu.pipeline_mode<synchronous>, transform_indices = @transform_10, window_bounds = array<i64: 8, 32>}, {pipeline_mode = #tpu.pipeline_mode<synchronous>, transform_indices = @transform_11, window_bounds = array<i64: 8, 1>}, {transform_indices = @transform_12, window_bounds = array<i64: 1, 1, 8>}, {transform_indices = @transform_13, window_bounds = array<i64: 1, 8, 8>}]} {
    %c0 = arith.constant 0 : index
    %c0_0 = arith.constant 0 : index
    %c0_1 = arith.constant 0 : index
    %0 = vector.load %arg1[%c0, %c0_0, %c0_1] : memref<1x8x16xf32, #tpu.memory_space<vmem>>, vector<1x8x16xf32>
    %1 = vector.shape_cast %0 : vector<1x8x16xf32> to vector<8x16xf32>
    %c0_2 = arith.constant 0 : index
    %c0_3 = arith.constant 0 : index
    %c0_4 = arith.constant 0 : index
    %2 = vector.load %arg2[%c0_2, %c0_3, %c0_4] : memref<1x8x1xi32, #tpu.memory_space<vmem>>, vector<1x8x1xi32>
    %3 = vector.shape_cast %2 : vector<1x8x1xi32> to vector<8x1xi32>
    %c0_5 = arith.constant 0 : index
    %c0_6 = arith.constant 0 : index
    %4 = vector.load %arg3[%c0_5, %c0_6] : memref<16x32xf32, #tpu.memory_space<vmem>>, vector<16x32xf32>
    %cst = arith.constant dense<0.000000e+00> : vector<8x32xf32>
    %5 = tpu.matmul %1, %4, %cst {dimension_numbers = #tpu.dot_dimension_numbers<[1], [0], [0], [1], [0, 0, 1, 1], [], []>} : vector<8x16xf32>, vector<16x32xf32>, vector<8x32xf32> -> vector<8x32xf32>
    %c0_7 = arith.constant 0 : index
    %c0_8 = arith.constant 0 : index
    %6 = vector.load %arg4[%c0_7, %c0_8] : memref<1x32xf32, #tpu.memory_space<vmem>>, vector<1x32xf32>
    %7 = vector.broadcast %6 : vector<1x32xf32> to vector<8x32xf32>
    %8 = arith.addf %5, %7 : vector<8x32xf32>
    %9 = math.tanh %8 : vector<8x32xf32>
    %c0_9 = arith.constant 0 : index
    %c0_10 = arith.constant 0 : index
    %10 = vector.load %arg5[%c0_9, %c0_10] : memref<32x8xf32, #tpu.memory_space<vmem>>, vector<32x8xf32>
    %cst_11 = arith.constant dense<0.000000e+00> : vector<8x8xf32>
    %11 = tpu.matmul %9, %10, %cst_11 {dimension_numbers = #tpu.dot_dimension_numbers<[1], [0], [0], [1], [0, 0, 1, 1], [], []>} : vector<8x32xf32>, vector<32x8xf32>, vector<8x8xf32> -> vector<8x8xf32>
    %c0_12 = arith.constant 0 : index
    %c0_13 = arith.constant 0 : index
    %12 = vector.load %arg6[%c0_12, %c0_13] : memref<1x8xf32, #tpu.memory_space<vmem>>, vector<1x8xf32>
    %13 = vector.broadcast %12 : vector<1x8xf32> to vector<8x8xf32>
    %14 = arith.addf %11, %13 : vector<8x8xf32>
    %15 = tpu.iota {dimensions = array<i32: 1>} : vector<8x8xi32>
    %cst_14 = arith.constant dense<0xFF800000> : vector<8xf32>
    %16 = vector.multi_reduction <maximumf>, %14, %cst_14 [1] : vector<8x8xf32> to vector<8xf32>
    %17 = vector.shape_cast %16 : vector<8xf32> to vector<8x1xf32>
    %18 = vector.broadcast %17 : vector<8x1xf32> to vector<8x8xf32>
    %19 = arith.cmpf oge, %14, %18 : vector<8x8xf32>
    %c8_i32 = arith.constant 8 : i32
    %20 = vector.broadcast %c8_i32 : i32 to vector<8x8xi32>
    %21 = arith.select %19, %15, %20 : vector<8x8xi1>, vector<8x8xi32>
    %cst_15 = arith.constant dense<2147483647> : vector<8xi32>
    %22 = vector.multi_reduction <minsi>, %21, %cst_15 [1] : vector<8x8xi32> to vector<8xi32>
    %23 = vector.shape_cast %22 : vector<8xi32> to vector<8x1xi32>
    %24 = arith.muli %23, %3 : vector<8x1xi32>
    %c0_i32 = arith.constant 0 : i32
    %25 = vector.broadcast %c0_i32 : i32 to vector<8x1xi32>
    %26 = arith.cmpi eq, %24, %25 : vector<8x1xi32>
    %c1_i32 = arith.constant 1 : i32
    %27 = vector.broadcast %c1_i32 : i32 to vector<8x1xi32>
    %28 = arith.select %26, %27, %24 : vector<8x1xi1>, vector<8x1xi32>
    %29 = tpu.iota {dimensions = array<i32: 0>} : vector<8x1xi32>
    %c0_i32_16 = arith.constant 0 : i32
    %30 = vector.broadcast %c0_i32_16 : i32 to vector<8x1xi32>
    %31 = arith.cmpi eq, %29, %30 : vector<8x1xi32>
    %c0_i32_17 = arith.constant 0 : i32
    %32 = vector.broadcast %c0_i32_17 : i32 to vector<8x1xi32>
    %33 = arith.cmpi sgt, %28, %32 : vector<8x1xi32>
    %34 = arith.andi %31, %33 : vector<8x1xi1>
    %c1_i32_18 = arith.constant 1 : i32
    %35 = vector.broadcast %c1_i32_18 : i32 to vector<8x1xi32>
    %36 = arith.andi %28, %35 : vector<8x1xi32>
    %c0_i32_19 = arith.constant 0 : i32
    %37 = vector.broadcast %c0_i32_19 : i32 to vector<8x1xi32>
    %38 = arith.cmpi eq, %36, %37 : vector<8x1xi32>
    %39 = arith.andi %34, %38 : vector<8x1xi1>
    %c1_i32_20 = arith.constant 1 : i32
    %40 = vector.broadcast %c1_i32_20 : i32 to vector<8x1xi32>
    %41 = arith.addi %28, %40 : vector<8x1xi32>
    %42 = arith.select %39, %41, %28 : vector<8x1xi1>, vector<8x1xi32>
    %c1_i32_21 = arith.constant 1 : i32
    %43 = vector.broadcast %c1_i32_21 : i32 to vector<8x1xi32>
    %44 = arith.cmpi sgt, %42, %43 : vector<8x1xi32>
    %c0_i32_22 = arith.constant 0 : i32
    %45 = vector.broadcast %c0_i32_22 : i32 to vector<8x1xi32>
    %46 = arith.cmpi sgt, %3, %45 : vector<8x1xi32>
    %47 = arith.andi %44, %46 : vector<8x1xi1>
    %48 = arith.extui %47 : vector<8x1xi1> to vector<8x1xi32>
    %49 = arith.sitofp %48 : vector<8x1xi32> to vector<8x1xf32>
    %cst_23 = arith.constant dense<0.000000e+00> : vector<1xf32>
    %50 = vector.multi_reduction <add>, %49, %cst_23 [0] : vector<8x1xf32> to vector<1xf32>
    %51 = vector.shape_cast %50 : vector<1xf32> to vector<1x1xf32>
    %cst_24 = arith.constant 1.250000e-01 : f32
    %52 = vector.broadcast %cst_24 : f32 to vector<8x1xf32>
    %53 = arith.mulf %52, %49 : vector<8x1xf32>
    %54 = vector.broadcast %51 : vector<1x1xf32> to vector<8x1xf32>
    %55 = arith.mulf %53, %54 : vector<8x1xf32>
    %c0_25 = arith.constant 0 : index
    %c0_26 = arith.constant 0 : index
    %56 = vector.load %arg7[%c0_25, %c0_26] : memref<32x256xf32, #tpu.memory_space<vmem>>, vector<32x256xf32>
    %cst_27 = arith.constant dense<0.000000e+00> : vector<8x256xf32>
    %57 = tpu.matmul %9, %56, %cst_27 {dimension_numbers = #tpu.dot_dimension_numbers<[1], [0], [0], [1], [0, 0, 1, 1], [], []>} : vector<8x32xf32>, vector<32x256xf32>, vector<8x256xf32> -> vector<8x256xf32>
    %c0_28 = arith.constant 0 : index
    %c0_29 = arith.constant 0 : index
    %58 = vector.load %arg9[%c0_28, %c0_29] : memref<8x32xf32, #tpu.memory_space<vmem>>, vector<8x32xf32>
    %59 = vector.extract_strided_slice %57 {offsets = [0, 0], sizes = [8, 32], strides = [1, 1]} : vector<8x256xf32> to vector<8x32xf32>
    %cst_30 = arith.constant dense<0.000000e+00> : vector<8x8xf32>
    %60 = tpu.matmul %59, %9, %cst_30 {dimension_numbers = #tpu.dot_dimension_numbers<[1], [1], [0], [0], [0, 0, 1, 0], [], []>} : vector<8x32xf32>, vector<8x32xf32>, vector<8x8xf32> -> vector<8x8xf32>
    %c0_i32_31 = arith.constant 0 : i32
    %61 = vector.broadcast %c0_i32_31 : i32 to vector<8x8xi32>
    %cst_32 = arith.constant dense<0.000000e+00> : vector<8xf32>
    %62 = vector.multi_reduction <add>, %60, %cst_32 [1] : vector<8x8xf32> to vector<8xf32>
    %63 = vector.shape_cast %62 : vector<8xf32> to vector<8x1xf32>
    %cst_33 = arith.constant 8.000000e+00 : f32
    %64 = vector.broadcast %cst_33 : f32 to vector<8x1xf32>
    %65 = arith.divf %63, %64 : vector<8x1xf32>
    %66 = vector.extract_strided_slice %57 {offsets = [0, 32], sizes = [8, 32], strides = [1, 1]} : vector<8x256xf32> to vector<8x32xf32>
    %cst_34 = arith.constant dense<0.000000e+00> : vector<8x8xf32>
    %67 = tpu.matmul %66, %9, %cst_34 {dimension_numbers = #tpu.dot_dimension_numbers<[1], [1], [0], [0], [0, 0, 1, 0], [], []>} : vector<8x32xf32>, vector<8x32xf32>, vector<8x8xf32> -> vector<8x8xf32>
    %68 = arith.cmpf ogt, %67, %60 : vector<8x8xf32>
    %69 = arith.select %68, %67, %60 : vector<8x8xi1>, vector<8x8xf32>
    %c1_i32_35 = arith.constant 1 : i32
    %70 = vector.broadcast %c1_i32_35 : i32 to vector<8x8xi32>
    %71 = arith.select %68, %70, %61 : vector<8x8xi1>, vector<8x8xi32>
    %cst_36 = arith.constant dense<0.000000e+00> : vector<8xf32>
    %72 = vector.multi_reduction <add>, %67, %cst_36 [1] : vector<8x8xf32> to vector<8xf32>
    %73 = vector.shape_cast %72 : vector<8xf32> to vector<8x1xf32>
    %cst_37 = arith.constant 8.000000e+00 : f32
    %74 = vector.broadcast %cst_37 : f32 to vector<8x1xf32>
    %75 = arith.divf %73, %74 : vector<8x1xf32>
    %76 = vector.extract_strided_slice %57 {offsets = [0, 64], sizes = [8, 32], strides = [1, 1]} : vector<8x256xf32> to vector<8x32xf32>
    %cst_38 = arith.constant dense<0.000000e+00> : vector<8x8xf32>
    %77 = tpu.matmul %76, %9, %cst_38 {dimension_numbers = #tpu.dot_dimension_numbers<[1], [1], [0], [0], [0, 0, 1, 0], [], []>} : vector<8x32xf32>, vector<8x32xf32>, vector<8x8xf32> -> vector<8x8xf32>
    %78 = arith.cmpf ogt, %77, %69 : vector<8x8xf32>
    %79 = arith.select %78, %77, %69 : vector<8x8xi1>, vector<8x8xf32>
    %c2_i32 = arith.constant 2 : i32
    %80 = vector.broadcast %c2_i32 : i32 to vector<8x8xi32>
    %81 = arith.select %78, %80, %71 : vector<8x8xi1>, vector<8x8xi32>
    %cst_39 = arith.constant dense<0.000000e+00> : vector<8xf32>
    %82 = vector.multi_reduction <add>, %77, %cst_39 [1] : vector<8x8xf32> to vector<8xf32>
    %83 = vector.shape_cast %82 : vector<8xf32> to vector<8x1xf32>
    %cst_40 = arith.constant 8.000000e+00 : f32
    %84 = vector.broadcast %cst_40 : f32 to vector<8x1xf32>
    %85 = arith.divf %83, %84 : vector<8x1xf32>
    %86 = vector.extract_strided_slice %57 {offsets = [0, 96], sizes = [8, 32], strides = [1, 1]} : vector<8x256xf32> to vector<8x32xf32>
    %cst_41 = arith.constant dense<0.000000e+00> : vector<8x8xf32>
    %87 = tpu.matmul %86, %9, %cst_41 {dimension_numbers = #tpu.dot_dimension_numbers<[1], [1], [0], [0], [0, 0, 1, 0], [], []>} : vector<8x32xf32>, vector<8x32xf32>, vector<8x8xf32> -> vector<8x8xf32>
    %88 = arith.cmpf ogt, %87, %79 : vector<8x8xf32>
    %89 = arith.select %88, %87, %79 : vector<8x8xi1>, vector<8x8xf32>
    %c3_i32 = arith.constant 3 : i32
    %90 = vector.broadcast %c3_i32 : i32 to vector<8x8xi32>
    %91 = arith.select %88, %90, %81 : vector<8x8xi1>, vector<8x8xi32>
    %cst_42 = arith.constant dense<0.000000e+00> : vector<8xf32>
    %92 = vector.multi_reduction <add>, %87, %cst_42 [1] : vector<8x8xf32> to vector<8xf32>
    %93 = vector.shape_cast %92 : vector<8xf32> to vector<8x1xf32>
    %cst_43 = arith.constant 8.000000e+00 : f32
    %94 = vector.broadcast %cst_43 : f32 to vector<8x1xf32>
    %95 = arith.divf %93, %94 : vector<8x1xf32>
    %96 = vector.extract_strided_slice %57 {offsets = [0, 128], sizes = [8, 32], strides = [1, 1]} : vector<8x256xf32> to vector<8x32xf32>
    %cst_44 = arith.constant dense<0.000000e+00> : vector<8x8xf32>
    %97 = tpu.matmul %96, %9, %cst_44 {dimension_numbers = #tpu.dot_dimension_numbers<[1], [1], [0], [0], [0, 0, 1, 0], [], []>} : vector<8x32xf32>, vector<8x32xf32>, vector<8x8xf32> -> vector<8x8xf32>
    %98 = arith.cmpf ogt, %97, %89 : vector<8x8xf32>
    %99 = arith.select %98, %97, %89 : vector<8x8xi1>, vector<8x8xf32>
    %c4_i32 = arith.constant 4 : i32
    %100 = vector.broadcast %c4_i32 : i32 to vector<8x8xi32>
    %101 = arith.select %98, %100, %91 : vector<8x8xi1>, vector<8x8xi32>
    %cst_45 = arith.constant dense<0.000000e+00> : vector<8xf32>
    %102 = vector.multi_reduction <add>, %97, %cst_45 [1] : vector<8x8xf32> to vector<8xf32>
    %103 = vector.shape_cast %102 : vector<8xf32> to vector<8x1xf32>
    %cst_46 = arith.constant 8.000000e+00 : f32
    %104 = vector.broadcast %cst_46 : f32 to vector<8x1xf32>
    %105 = arith.divf %103, %104 : vector<8x1xf32>
    %106 = vector.extract_strided_slice %57 {offsets = [0, 160], sizes = [8, 32], strides = [1, 1]} : vector<8x256xf32> to vector<8x32xf32>
    %cst_47 = arith.constant dense<0.000000e+00> : vector<8x8xf32>
    %107 = tpu.matmul %106, %9, %cst_47 {dimension_numbers = #tpu.dot_dimension_numbers<[1], [1], [0], [0], [0, 0, 1, 0], [], []>} : vector<8x32xf32>, vector<8x32xf32>, vector<8x8xf32> -> vector<8x8xf32>
    %108 = arith.cmpf ogt, %107, %99 : vector<8x8xf32>
    %109 = arith.select %108, %107, %99 : vector<8x8xi1>, vector<8x8xf32>
    %c5_i32 = arith.constant 5 : i32
    %110 = vector.broadcast %c5_i32 : i32 to vector<8x8xi32>
    %111 = arith.select %108, %110, %101 : vector<8x8xi1>, vector<8x8xi32>
    %cst_48 = arith.constant dense<0.000000e+00> : vector<8xf32>
    %112 = vector.multi_reduction <add>, %107, %cst_48 [1] : vector<8x8xf32> to vector<8xf32>
    %113 = vector.shape_cast %112 : vector<8xf32> to vector<8x1xf32>
    %cst_49 = arith.constant 8.000000e+00 : f32
    %114 = vector.broadcast %cst_49 : f32 to vector<8x1xf32>
    %115 = arith.divf %113, %114 : vector<8x1xf32>
    %116 = vector.extract_strided_slice %57 {offsets = [0, 192], sizes = [8, 32], strides = [1, 1]} : vector<8x256xf32> to vector<8x32xf32>
    %cst_50 = arith.constant dense<0.000000e+00> : vector<8x8xf32>
    %117 = tpu.matmul %116, %9, %cst_50 {dimension_numbers = #tpu.dot_dimension_numbers<[1], [1], [0], [0], [0, 0, 1, 0], [], []>} : vector<8x32xf32>, vector<8x32xf32>, vector<8x8xf32> -> vector<8x8xf32>
    %118 = arith.cmpf ogt, %117, %109 : vector<8x8xf32>
    %119 = arith.select %118, %117, %109 : vector<8x8xi1>, vector<8x8xf32>
    %c6_i32 = arith.constant 6 : i32
    %120 = vector.broadcast %c6_i32 : i32 to vector<8x8xi32>
    %121 = arith.select %118, %120, %111 : vector<8x8xi1>, vector<8x8xi32>
    %cst_51 = arith.constant dense<0.000000e+00> : vector<8xf32>
    %122 = vector.multi_reduction <add>, %117, %cst_51 [1] : vector<8x8xf32> to vector<8xf32>
    %123 = vector.shape_cast %122 : vector<8xf32> to vector<8x1xf32>
    %cst_52 = arith.constant 8.000000e+00 : f32
    %124 = vector.broadcast %cst_52 : f32 to vector<8x1xf32>
    %125 = arith.divf %123, %124 : vector<8x1xf32>
    %126 = vector.extract_strided_slice %57 {offsets = [0, 224], sizes = [8, 32], strides = [1, 1]} : vector<8x256xf32> to vector<8x32xf32>
    %cst_53 = arith.constant dense<0.000000e+00> : vector<8x8xf32>
    %127 = tpu.matmul %126, %9, %cst_53 {dimension_numbers = #tpu.dot_dimension_numbers<[1], [1], [0], [0], [0, 0, 1, 0], [], []>} : vector<8x32xf32>, vector<8x32xf32>, vector<8x8xf32> -> vector<8x8xf32>
    %128 = arith.cmpf ogt, %127, %119 : vector<8x8xf32>
    %c7_i32 = arith.constant 7 : i32
    %129 = vector.broadcast %c7_i32 : i32 to vector<8x8xi32>
    %130 = arith.select %128, %129, %121 : vector<8x8xi1>, vector<8x8xi32>
    %cst_54 = arith.constant dense<0.000000e+00> : vector<8xf32>
    %131 = vector.multi_reduction <add>, %127, %cst_54 [1] : vector<8x8xf32> to vector<8xf32>
    %132 = vector.shape_cast %131 : vector<8xf32> to vector<8x1xf32>
    %cst_55 = arith.constant 8.000000e+00 : f32
    %133 = vector.broadcast %cst_55 : f32 to vector<8x1xf32>
    %134 = arith.divf %132, %133 : vector<8x1xf32>
    %135 = tpu.concatenate %65, %75, %85, %95, %105, %115, %125, %134 in 1 : vector<8x1xf32>, vector<8x1xf32>, vector<8x1xf32>, vector<8x1xf32>, vector<8x1xf32>, vector<8x1xf32>, vector<8x1xf32>, vector<8x1xf32> -> vector<8x8xf32>
    %cst_56 = arith.constant dense<0.000000e+00> : vector<32xf32>
    %136 = vector.multi_reduction <add>, %58, %cst_56 [0] : vector<8x32xf32> to vector<32xf32>
    %137 = vector.shape_cast %136 : vector<32xf32> to vector<1x32xf32>
    %cst_57 = arith.constant dense<0.000000e+00> : vector<8x32xf32>
    %138 = tpu.matmul %135, %58, %cst_57 {dimension_numbers = #tpu.dot_dimension_numbers<[1], [0], [0], [1], [0, 0, 1, 1], [], []>} : vector<8x8xf32>, vector<8x32xf32>, vector<8x32xf32> -> vector<8x32xf32>
    %139 = vector.broadcast %55 : vector<8x1xf32> to vector<8x32xf32>
    %140 = vector.broadcast %137 : vector<1x32xf32> to vector<8x32xf32>
    %141 = arith.mulf %139, %140 : vector<8x32xf32>
    %142 = arith.addf %138, %141 : vector<8x32xf32>
    %c0_58 = arith.constant 0 : index
    %c0_59 = arith.constant 0 : index
    %143 = vector.load %arg8[%c0_58, %c0_59] : memref<32x32xf32, #tpu.memory_space<vmem>>, vector<32x32xf32>
    %cst_60 = arith.constant dense<0.000000e+00> : vector<8x32xf32>
    %144 = tpu.matmul %9, %143, %cst_60 {dimension_numbers = #tpu.dot_dimension_numbers<[1], [0], [0], [1], [0, 0, 1, 1], [], []>} : vector<8x32xf32>, vector<32x32xf32>, vector<8x32xf32> -> vector<8x32xf32>
    %145 = arith.addf %144, %142 : vector<8x32xf32>
    %c0_61 = arith.constant 0 : index
    %c0_62 = arith.constant 0 : index
    %146 = vector.load %arg10[%c0_61, %c0_62] : memref<1x32xf32, #tpu.memory_space<vmem>>, vector<1x32xf32>
    %147 = vector.broadcast %146 : vector<1x32xf32> to vector<8x32xf32>
    %148 = arith.addf %145, %147 : vector<8x32xf32>
    %149 = math.tanh %148 : vector<8x32xf32>
    %c0_63 = arith.constant 0 : index
    %c0_64 = arith.constant 0 : index
    %150 = vector.load %arg11[%c0_63, %c0_64] : memref<8x32xf32, #tpu.memory_space<vmem>>, vector<8x32xf32>
    %cst_65 = arith.constant dense<0.000000e+00> : vector<8x8xf32>
    %151 = tpu.matmul %150, %149, %cst_65 {dimension_numbers = #tpu.dot_dimension_numbers<[1], [1], [0], [0], [0, 0, 1, 0], [], []>} : vector<8x32xf32>, vector<8x32xf32>, vector<8x8xf32> -> vector<8x8xf32>
    %c0_66 = arith.constant 0 : index
    %c0_67 = arith.constant 0 : index
    %152 = vector.load %arg12[%c0_66, %c0_67] : memref<8x1xf32, #tpu.memory_space<vmem>>, vector<8x1xf32>
    %153 = vector.broadcast %152 : vector<8x1xf32> to vector<8x8xf32>
    %154 = arith.addf %151, %153 : vector<8x8xf32>
    %155 = tpu.iota {dimensions = array<i32: 0>} : vector<8x8xi32>
    %cst_68 = arith.constant dense<0xFF800000> : vector<8xf32>
    %156 = vector.multi_reduction <maximumf>, %154, %cst_68 [0] : vector<8x8xf32> to vector<8xf32>
    %157 = vector.shape_cast %156 : vector<8xf32> to vector<1x8xf32>
    %158 = vector.broadcast %157 : vector<1x8xf32> to vector<8x8xf32>
    %159 = arith.cmpf oge, %154, %158 : vector<8x8xf32>
    %c8_i32_69 = arith.constant 8 : i32
    %160 = vector.broadcast %c8_i32_69 : i32 to vector<8x8xi32>
    %161 = arith.select %159, %155, %160 : vector<8x8xi1>, vector<8x8xi32>
    %cst_70 = arith.constant dense<2147483647> : vector<8xi32>
    %162 = vector.multi_reduction <minsi>, %161, %cst_70 [0] : vector<8x8xi32> to vector<8xi32>
    %163 = vector.shape_cast %162 : vector<8xi32> to vector<1x8xi32>
    %c0_71 = arith.constant 0 : index
    %c0_72 = arith.constant 0 : index
    %c0_73 = arith.constant 0 : index
    %164 = vector.load %arg13[%c0_71, %c0_72, %c0_73] : memref<1x1x8xi32, #tpu.memory_space<vmem>>, vector<1x1x8xi32>
    %165 = vector.shape_cast %164 : vector<1x1x8xi32> to vector<1x8xi32>
    %166 = vector.shape_cast %163 : vector<1x8xi32> to vector<1x1x8xi32>
    tpu.vector_store %arg13[%c0_71, %c0_72, %c0_73], %166 {strides = array<i32>} : memref<1x1x8xi32, #tpu.memory_space<vmem>>, vector<1x1x8xi32>,
    %c0_74 = arith.constant 0 : index
    %c0_75 = arith.constant 0 : index
    %c0_76 = arith.constant 0 : index
    %167 = vector.load %arg14[%c0_74, %c0_75, %c0_76] : memref<1x8x8xi32, #tpu.memory_space<vmem>>, vector<1x8x8xi32>
    %168 = vector.shape_cast %167 : vector<1x8x8xi32> to vector<8x8xi32>
    %169 = vector.shape_cast %130 : vector<8x8xi32> to vector<1x8x8xi32>
    tpu.vector_store %arg14[%c0_74, %c0_75, %c0_76], %169 {strides = array<i32>} : memref<1x8x8xi32, #tpu.memory_space<vmem>>, vector<1x8x8xi32>,
    return
  }
  func.func @transform_0(%arg0: i32) -> (i32, i32, i32) {
    %c0_i32 = arith.constant 0 : i32
    %c0_i32_0 = arith.constant 0 : i32
    %c0_i32_1 = arith.constant 0 : i32
    return %arg0, %c0_i32, %c0_i32_0 : i32, i32, i32
  }
  func.func @transform_1(%arg0: i32) -> (i32, i32, i32) {
    %c0_i32 = arith.constant 0 : i32
    %c0_i32_0 = arith.constant 0 : i32
    %c0_i32_1 = arith.constant 0 : i32
    return %arg0, %c0_i32, %c0_i32_0 : i32, i32, i32
  }
  func.func @transform_2(%arg0: i32) -> (i32, i32) {
    %c0_i32 = arith.constant 0 : i32
    %c0_i32_0 = arith.constant 0 : i32
    %c0_i32_1 = arith.constant 0 : i32
    return %c0_i32, %c0_i32_0 : i32, i32
  }
  func.func @transform_3(%arg0: i32) -> (i32, i32) {
    %c0_i32 = arith.constant 0 : i32
    %c0_i32_0 = arith.constant 0 : i32
    %c0_i32_1 = arith.constant 0 : i32
    return %c0_i32, %c0_i32_0 : i32, i32
  }
  func.func @transform_4(%arg0: i32) -> (i32, i32) {
    %c0_i32 = arith.constant 0 : i32
    %c0_i32_0 = arith.constant 0 : i32
    %c0_i32_1 = arith.constant 0 : i32
    return %c0_i32, %c0_i32_0 : i32, i32
  }
  func.func @transform_5(%arg0: i32) -> (i32, i32) {
    %c0_i32 = arith.constant 0 : i32
    %c0_i32_0 = arith.constant 0 : i32
    %c0_i32_1 = arith.constant 0 : i32
    return %c0_i32, %c0_i32_0 : i32, i32
  }
  func.func @transform_6(%arg0: i32) -> (i32, i32) {
    %c0_i32 = arith.constant 0 : i32
    %c0_i32_0 = arith.constant 0 : i32
    %c0_i32_1 = arith.constant 0 : i32
    return %c0_i32, %c0_i32_0 : i32, i32
  }
  func.func @transform_7(%arg0: i32) -> (i32, i32) {
    %c0_i32 = arith.constant 0 : i32
    %c0_i32_0 = arith.constant 0 : i32
    %c0_i32_1 = arith.constant 0 : i32
    return %c0_i32, %c0_i32_0 : i32, i32
  }
  func.func @transform_8(%arg0: i32) -> (i32, i32) {
    %c0_i32 = arith.constant 0 : i32
    %c0_i32_0 = arith.constant 0 : i32
    %c0_i32_1 = arith.constant 0 : i32
    return %c0_i32, %c0_i32_0 : i32, i32
  }
  func.func @transform_9(%arg0: i32) -> (i32, i32) {
    %c0_i32 = arith.constant 0 : i32
    %c0_i32_0 = arith.constant 0 : i32
    %c0_i32_1 = arith.constant 0 : i32
    return %c0_i32, %c0_i32_0 : i32, i32
  }
  func.func @transform_10(%arg0: i32) -> (i32, i32) {
    %c0_i32 = arith.constant 0 : i32
    %c0_i32_0 = arith.constant 0 : i32
    %c0_i32_1 = arith.constant 0 : i32
    return %c0_i32, %c0_i32_0 : i32, i32
  }
  func.func @transform_11(%arg0: i32) -> (i32, i32) {
    %c0_i32 = arith.constant 0 : i32
    %c0_i32_0 = arith.constant 0 : i32
    %c0_i32_1 = arith.constant 0 : i32
    return %c0_i32, %c0_i32_0 : i32, i32
  }
  func.func @transform_12(%arg0: i32) -> (i32, i32, i32) {
    %c0_i32 = arith.constant 0 : i32
    %c0_i32_0 = arith.constant 0 : i32
    %c0_i32_1 = arith.constant 0 : i32
    return %arg0, %c0_i32, %c0_i32_0 : i32, i32, i32
  }
  func.func @transform_13(%arg0: i32) -> (i32, i32, i32) {
    %c0_i32 = arith.constant 0 : i32
    %c0_i32_0 = arith.constant 0 : i32
    %c0_i32_1 = arith.constant 0 : i32
    return %arg0, %c0_i32, %c0_i32_0 : i32, i32, i32
  }
}

</mosaic_0001>

<bundles_post_ra>
// kernel: seqlabel_forward.1
= control target key start
LH: loop header
LB: loop body
LE: loop exit
PB: predicated region body
PF: predicated region fallthrough
CT: control target
= control target key end

     0   :  { %s2561_s0 = inlined_call_operand.vmem [shape: f32[2,8,16], index: 0, kind: input, shape index: {}]   ;;  %s2562_s1 = inlined_call_operand.vmem [shape: s32[2,8,1], index: 1, kind: input, shape index: {}]   ;;  %s2563_s2 = inlined_call_operand.vmem [shape: f32[16,32], index: 2, kind: input, shape index: {}]   ;;  %s2564_s3 = inlined_call_operand.vmem [shape: f32[1,32], index: 3, kind: input, shape index: {}]   ;;  %s2565_s4 = inlined_call_operand.vmem [shape: f32[32,8], index: 4, kind: input, shape index: {}]   ;;  %s2566_s5 = inlined_call_operand.vmem [shape: f32[1,8], index: 5, kind: input, shape index: {}]   ;;  %s2567_s6 = inlined_call_operand.vmem [shape: f32[32,256], index: 6, kind: input, shape index: {}]   ;;  %s2568_s7 = inlined_call_operand.vmem [shape: f32[32,32], index: 7, kind: input, shape index: {}]   ;;  %s2569_s8 = inlined_call_operand.vmem [shape: f32[8,32], index: 8, kind: input, shape index: {}]   ;;  %s2570_s9 = inlined_call_operand.vmem [shape: f32[1,32], index: 9, kind: input, shape index: {}]   ;;  %s2571_s10 = inlined_call_operand.vmem [shape: f32[8,32], index: 10, kind: input, shape index: {}]   ;;  %s2572_s11 = inlined_call_operand.vmem [shape: f32[8,1], index: 11, kind: input, shape index: {}]   ;;  %s2573_s12 = inlined_call_operand.hbm [shape: s32[2,1,8], index: 12, kind: output, shape index: {0}]   ;;  %s2574_s13 = inlined_call_operand.hbm [shape: s32[2,8,8], index: 13, kind: output, shape index: {1}]  }
   0x1   :  { %2578 = sst [smem:[#allocation11_spill]] %s2561_s0 }
   0x2   :  { %2579 = sst [smem:[#allocation12_spill]] %s2563_s2 }
   0x3   :  { %19 = vsyncpa [#allocation3], 0 }
   0x4   :  { %21 = vsyncpa [#allocation3 + $0x1], 0 }
   0x5   :  { %22 = vsyncpa [#allocation5], 0 }
   0x6   :  { %24 = vsyncpa [#allocation5 + $0x1], 0  ;;  %s2231_s25 = smov 0   ;;  %s2233_s26 = smov 0  }
   0x7   :  { %s2235_s27 = smov 0   ;;  %s2237_s28 = smov 0  }
   0x8 LB: > { %2580 = sst [smem:[#allocation8_spill]] %s2146_s27  ;;  %s2252_s29 = sadd.s32 4294967295, %s2150_s28   ;;  %s2150_s28 = sphi %s2237_s28, %s2587_s28   ;;  %s2146_s27 = sphi %s2235_s27, %s2589_s27   ;;  %s2142_s26 = sphi %s2233_s26, %s2591_s26   ;;  %s2138_s25 = sphi %s2231_s25, %s2590_s25  }
   0x9   : > { %s1825_s30 = sadd.s32 4294967294, %s2150_s28   ;;  %s2256_s14 = sadd.s32 1, %s2150_s28  }
   0xa   : > { %2581 = sst [smem:[#allocation9_spill]] %s2256_s14  ;;  %s299_s15 = sadd.s32 1, %s2146_s27 }
   0xb   : > { %s296_s16 = ssub.s32 %s2150_s28, %s2256_s14  ;;  %p309_p0 = scmp.ne.s32.totalorder %s2146_s27, %s2142_s26 }
   0xc   : > { %p297_p1 = scmp.eq.s32.totalorder %s296_s16, 0  ;;  %p310_p2 = scmp.eq.s32.totalorder %s2252_s29, 1 }
   0xd   : > { %p315_p3 = scmp.ne.s32.totalorder %s2142_s26, %s2138_s25  ;;  %p316_p4 = scmp.eq.s32.totalorder %s1825_s30, 1 }
   0xe   : > { %s2267_s17 = scalar_select %p297_p1, %s2146_s27, %s299_s15  }
   0xf   : > { %p2269_p5 = por %p310_p2, %p309_p0  ;;  %p2273_p6 = por %p316_p4, %p315_p3 }
  0x10   : > { %2582 = sst [smem:[#allocation10_spill]] %s2267_s17  ;;  %p1828_p7 = scmp.ge.s32.totalorder %s2150_s28, 1 }
  0x11   : > { %p404_p8 = scmp.lt.s32.totalorder %s2150_s28, 3 }
  0x13   : > { %p405_p9 = pnand %p1828_p7, %p404_p8 }
  0x14   : > { %s2585_s2 = sld [smem:[#allocation12_spill]] (!%p405_p9)  ;;  %p455_p10 = scmp.lt.s32.totalorder (!%p405_p9), %s2252_s29, 1  ;;  %v2152_v2 = vmov (!%p405_p9), 0.0|0.0   ;;  %vm2153_vm0 = vmmov (!%p405_p9), 0   ;;  %v2154_v4 = vmov (!%p405_p9), 0.0   ;;  %vm474_vm1 = vcmask (!%p405_p9), 130048  }
  0x15   : > { %408 = sbr.rel (%p405_p9) target bundleno = 1537 (0x601), region = 68  ;;  %1976 = vmatprep.subr.bf16.mxu0 (!%p405_p9), %v2152_v2  ;;  %1901 = vmatprep.mubr.msk.f32.mxu0 (!%p405_p9), %vm2153_vm0, %v2154_v4  ;;  %s2586_s0 = sld [smem:[#allocation11_spill]] (!%p405_p9)  ;;  %v686_v6 = vld [vmem:[%s2567_s6 + $0x8] sm:$0xff] (!%p405_p9)  ;;  %v688_v7 = vld [vmem:[%s2567_s6 + $0x18] sm:$0xff] (!%p405_p9)  ;;  %v549_v9 = vld [vmem:[%s2565_s4] sm:$0xff] (!%p405_p9)  ;;  %vm560_vm2 = vcmask (!%p405_p9), 261120   ;;  %v634_v52 = vlaneseq (!%p405_p9) }
  0x16   : > { %1979 = vmatprep.subr.bf16.mxu1 (!%p405_p9), %v2152_v2  ;;  %1912 = vmatprep.mubr.msk.f32.mxu1 (!%p405_p9), %vm2153_vm0, %v2154_v4  ;;  %v1985_v8 = vpack.c.bf16 (!%p405_p9), %v688_v7, %v686_v6  ;;  %v550_v10 = vld [vmem:[%s2565_s4 + $0x8] sm:$0xff] (!%p405_p9)  ;;  %v685_v11 = vld [vmem:[%s2567_s6] sm:$0xff] (!%p405_p9)  ;;  %v687_v13 = vld [vmem:[%s2567_s6 + $0x10] sm:$0xff] (!%p405_p9)  ;;  %s2155_s14 = smov (!%p405_p9), 32   ;;  %s2156_s15 = smov (!%p405_p9), 96   ;;  %vm636_vm3 = vcmask (!%p405_p9), 64512  }
  0x17   : > { %v1980_v12 = vpack.c.bf16 (!%p405_p9), %v550_v10, %v549_v9  ;;  %v1987_v14 = vpack.c.bf16 (!%p405_p9), %v687_v13, %v685_v11  ;;  %v690_v15 = vld [vmem:[%s2567_s6 + $0x28] sm:$0xff] (!%p405_p9)  ;;  %v692_v16 = vld [vmem:[%s2567_s6 + $0x38] sm:$0xff] (!%p405_p9)  ;;  %v551_v18 = vld [vmem:[%s2565_s4 + $0x10] sm:$0xff] (!%p405_p9)  ;;  %s2157_s16 = smov (!%p405_p9), 64   ;;  %v2158_v48 = vmov (!%p405_p9), 0   ;;  %v635_v57 = vand.u32 (!%p405_p9), 127, %v634_v52 }
  0x18   : > { %v1989_v17 = vpack.c.bf16 (!%p405_p9), %v692_v16, %v690_v15  ;;  %v552_v19 = vld [vmem:[%s2565_s4 + $0x18] sm:$0xff] (!%p405_p9)  ;;  %v689_v20 = vld [vmem:[%s2567_s6 + $0x20] sm:$0xff] (!%p405_p9)  ;;  %v691_v22 = vld [vmem:[%s2567_s6 + $0x30] sm:$0xff] (!%p405_p9)  ;;  %2050 = vset.pattern.permute.xlu0 (!%p405_p9), %v2158_v48  ;;  %2051 = vset.pattern.permute.xlu1 (!%p405_p9), %v2158_v48  ;;  %vm675_vm12 = vcmask (!%p405_p9), 7168   ;;  %vm1409_vm13 = vcmask (!%p405_p9), 15360   ;;  %vm1411_vm14 = vcmask (!%p405_p9), 23552  }
  0x19   : > { %1981 = vmatpush3.bf16.msra.mxu1 (!%p405_p9), %v1980_v12  ;;  %v1983_v21 = vpack.c.bf16 (!%p405_p9), %v552_v19, %v551_v18  ;;  %v1991_v23 = vpack.c.bf16 (!%p405_p9), %v691_v22, %v689_v20  ;;  %v1832_v24 = vld [vmem:[%s2564_s3] ss:$0 sm:$0xff] (!%p405_p9)  ;;  %v1508_v41 = vld [vmem:[%s2568_s7 + $0x8] sm:$0xff] (!%p405_p9)  ;;  %v1509_v43 = vld [vmem:[%s2568_s7 + $0x10] sm:$0xff] (!%p405_p9)  ;;  %vm1413_vm15 = vcmask (!%p405_p9), 31744   ;;  %s1861_s23 = sshll.u32 (!%p405_p9), %s2252_s29, 7 }
  0x1a   : > { %v465_v0 = vld [vmem:[%s2585_s2] sm:$0xff] (!%p405_p9)  ;;  %v466_v1 = vld [vmem:[%s2585_s2 + $0x8] sm:$0xff] (!%p405_p9)  ;;  %1982 = vmatprep.subr.bf16.mxu1 (!%p405_p9), %v2152_v2  ;;  %v1510_v44 = vld [vmem:[%s2568_s7 + $0x18] sm:$0xff] (!%p405_p9) }
  0x1b   : > { %v1977_v3 = vpack.c.bf16 (!%p405_p9), %v466_v1, %v465_v0  ;;  %v1834_v33 = vld [vmem:[%s2566_s5] ss:$0 sm:$0xff] (!%p405_p9)  ;;  %v1997_v47 = vpack.c.bf16 (!%p405_p9), %v1510_v44, %v1509_v43 }
  0x1c   : > { %s2290_s24 = scalar_select %p455_p10, %s2252_s29, 1  ;;  %v1507_v40 = vld [vmem:[%s2568_s7] sm:$0xff] }
  0x1d   : > { %1978 = vmatpush3.bf16.msra.mxu0 %v1977_v3  ;;  %1984 = vmatpush3.bf16.msra.mxu1 %v1983_v21  ;;  %v1994_v42 = vpack.c.bf16 %v1508_v41, %v1507_v40 }
  0x1e   : > { %s1830_s30 = sshll.u32 %s2290_s24, 3  ;;  %1986 = vmatprep.subr.bf16.mxu0 %v1985_v8  ;;  %1915 = vmatprep.subr.mxu1 %v2154_v4  ;;  %s2490_s24 = scalar_lea.hbm %s2574_s13, %s1861_s23 }
  0x1f   : > { %s458_s20 = scalar_lea.vmem %s2586_s0, %s1830_s30 }
  0x20   : > { %v463_v5 = vld [vmem:[%s458_s20] sm:$0xff]  ;;  %s2431_s20 = sand.u32 1, %s2142_s26  }
  0x21   : > { %1902 = vmatmul.mubr.msk.f32.vlgmr.msra.gmra.mrb[0].mxu0 %vm474_vm1, %v463_v5  ;;  %s1829_s21 = sshll.u32 %s2431_s20, 3  ;;  %vm1415_vm1 = vcmask 39936  }
  0x22   : > { %757 = vmatprep.mubr.f32.mxu0 %v2154_v4  ;;  %1988 = vmatpush1.bf16.msra.mxu0 %v1987_v14  ;;  %s2442_s22 = scalar_lea.vmem [#allocation4], %s1829_s21 }
  0x23   : > { %1990 = vmatprep.subr.bf16.mxu0 %v1989_v17  ;;  %s1726_s27 = sshll.u32 %s2442_s22, 4  ;;  %s1727_s27 = int_to_ptr.vmem [resolvable:$true] %s1726_s27 }
  0x26   : > { %1992 = vmatpush1.bf16.msra.mxu0 %v1991_v23 }
  0x27   : > { %1920 = vmatprep.subr.mxu0 %v2154_v4 }
  0xf4   : > { %v544_v25 = vpop.f32.mrb[0].mxu0 }
  0xf5   : > { %v545_v26 = vadd.f32 %v1832_v24, %v544_v25  ;;  %v1903_v27 = vpop.f32.mrb[1].mxu0 }
  0xf7   : > { %2052 = vtanh.f32 %v545_v26 }
 0x101   : > { %v2344_v28 = vpop.eup %2052 }
 0x102   : > { %1913 = vmatmul.mubr.msk.f32.vlgmr.msra.gmra.mrb[0].mxu1 %vm560_vm2, %v2344_v28  ;;  %1837 = vmatmul.mubr.msk.f32.vlgmr.msra.gmra.mrb[2].mxu0 %vm560_vm2, %v2344_v28 }
 0x103   : > { %1916 = vmatpush3.xpose.msk.msra.mxu1 %vm560_vm2, %v2344_v28  ;;  %1921 = vmatpush3.xpose.msk.msra.mxu0 %vm560_vm2, %v2344_v28 }
 0x104   : > { %1917 = vmatprep.mubr.msk.f32.mxu1 %vm2153_vm0, %v2154_v4  ;;  %1925 = vmatprep.subr.mxu1 %v2154_v4 }
 0x105   : > { %1922 = vmatprep.mubr.msk.f32.mxu0 %vm2153_vm0, %v2154_v4  ;;  %1930 = vmatprep.subr.mxu0 %v2154_v4 }
 0x1d5   : > { %v630_v29 = vpop.f32.mrb[0].mxu1  ;;  %v759_v30 = vpop.f32.mrb[2].mxu0 }
 0x1d6   : > { %v1914_v31 = vpop.f32.mrb[1].mxu1  ;;  %1005 = vrot.lane.b32.xlu1 %v759_v30, %s2155_s14  ;;  %843 = vrot.lane.b32.xlu0 %v759_v30, %s2156_s15  ;;  %v761_v32 = vpop.f32.mrb[3].mxu0  ;;  %v2369_v34 = vadd.f32 %v1834_v33, %v630_v29 }
 0x1d7   : > { %1918 = vmatmul.mubr.msk.f32.vlgmr.msra.gmra.mrb[2].mxu1 %vm560_vm2, %v759_v30 }
 0x1d8   : > { %1926 = vmatpush3.xpose.msk.msra.mxu1 %vm560_vm2, %v2344_v28  ;;  %1927 = vmatprep.mubr.msk.f32.mxu1 %vm2153_vm0, %v2154_v4  ;;  %v637_v35 = vsel %vm636_vm3, %v2369_v34, -inf }
 0x1d9   : > { %1935 = vmatprep.subr.mxu1 %v2154_v4 }
 0x1da   : > { %924 = vrot.lane.b32.xlu0 %v759_v30, %s2157_s16  ;;  %1166 = vrot.lane.b32.xlu1 %v761_v32, %s2156_s15  ;;  %s2056_s15 = scalar_lea.vmem %s1727_s27, 128 }
 0x1db   : > { %p2057_p11 = scmp.ne.s32.totalorder %s1727_s27, %s2056_s15 }
 0x1dd   : > { %p2058_p12 = pnand %p2057_p11, %p2269_p5 }
 0x1de   : > { %1247 = vrot.lane.b32.xlu0 %v761_v32, %s2157_s16  ;;  %1328 = vrot.lane.b32.xlu1 %v761_v32, %s2155_s14  ;;  %s462_s14 = scalar_lea.vmem %s2562_s1, %s1830_s30  ;;  %s1700_s30 = scalar_lea.sflag [#allocation5], %s2431_s20 }
 0x1df   : > { %p2059_p13 = pneg %p2058_p12  ;;  %s2159_s16 = smov [#allocation4]  }
 0x1e0   : > { %s2060_s0 = sshll.u32 %s2159_s16, 4  ;;  %s2061_s0 = int_to_ptr.vmem [resolvable:$false] %s2060_s0 }
 0x1e1   : > { %s2062_s21 = scalar_lea.vmem %s2061_s0, 256  ;;  %p2063_p0 = scmp.lt.s32.totalorder %s1727_s27, %s2061_s0 }
 0x1e2   : > { %p2064_p1 = scmp.lt.s32.totalorder %s2062_s21, %s2056_s15 }
 0x1e4   : > { %p2065_p2 = por %p2064_p1, %p2063_p0 }
 0x1e6   : > { %p2066_p3 = pnand %p2065_p2, %p2059_p13 }
 0x1fd   : > { %638 = vmax.xlane.f32.xlu0 %v637_v35 }
 0x248   : > { %v1006_v36 = vpop.permute.xlu1 %1005  ;;  %v844_v37 = vpop.permute.xlu0 %843 }
 0x249   : > { %1923 = vmatmul.mubr.msk.f32.vlgmr.msra.gmra.mrb[4].mxu0 %vm560_vm2, %v844_v37 }
 0x24a   : > { %1931 = vmatpush3.xpose.msk.msra.mxu0 %vm560_vm2, %v2344_v28  ;;  %1932 = vmatprep.mubr.msk.f32.mxu0 %vm2153_vm0, %v2154_v4 }
 0x24b   : > { %1940 = vmatprep.subr.mxu0 %v2154_v4 }
 0x24c   : > { %v925_v38 = vpop.permute.xlu0 %924  ;;  %v1167_v39 = vpop.permute.xlu1 %1166 }
 0x24d   : > { %1928 = vmatmul.mubr.msk.f32.vlgmr.msra.gmra.mrb[4].mxu1 %vm560_vm2, %v925_v38  ;;  %1933 = vmatmul.mubr.msk.f32.vlgmr.msra.gmra.mrb[6].mxu0 %vm560_vm2, %v1006_v36 }
 0x24e   : > { %1936 = vmatpush3.xpose.msk.msra.mxu1 %vm560_vm2, %v2344_v28  ;;  %1941 = vmatpush3.xpose.msk.msra.mxu0 %vm560_vm2, %v2344_v28 }
 0x24f   : > { %1937 = vmatprep.mubr.msk.f32.mxu1 %vm2153_vm0, %v2154_v4  ;;  %1942 = vmatprep.mubr.msk.f32.mxu0 %vm2153_vm0, %v2154_v4 }
 0x250   : > { %1945 = vmatprep.subr.mxu1 %v2154_v4  ;;  %1950 = vmatprep.subr.mxu0 %v2154_v4  ;;  %v1248_v45 = vpop.permute.xlu0 %1247  ;;  %v1329_v46 = vpop.permute.xlu1 %1328 }
 0x251   : > { %1938 = vmatmul.mubr.msk.f32.vlgmr.msra.gmra.mrb[6].mxu1 %vm560_vm2, %v761_v32  ;;  %1943 = vmatmul.mubr.msk.f32.vlgmr.msra.gmra.mrb[8].mxu0 %vm560_vm2, %v1167_v39  ;;  %v2451_v32 = vld [vmem:[%s2569_s8] sm:$0xff] }
 0x252   : > { %1946 = vmatpush3.xpose.msk.msra.mxu1 %vm560_vm2, %v2344_v28  ;;  %1951 = vmatpush3.xpose.msk.msra.mxu0 %vm560_vm2, %v2344_v28 }
 0x253   : > { %1947 = vmatprep.mubr.msk.f32.mxu1 %vm2153_vm0, %v2154_v4  ;;  %1952 = vmatprep.mubr.msk.f32.mxu0 %vm2153_vm0, %v2154_v4 }
 0x254   : > { %1993 = vmatprep.subr.bf16.mxu0 %v2152_v2  ;;  %1955 = vmatprep.subr.mxu1 %v2154_v4 }
 0x255   : > { %1948 = vmatmul.mubr.msk.f32.vlgmr.msra.gmra.mrb[8].mxu1 %vm560_vm2, %v1248_v45  ;;  %1953 = vmatmul.mubr.msk.f32.vlgmr.msra.gmra.mrb[10].mxu0 %vm560_vm2, %v1329_v46 }
 0x256   : > { %1995 = vmatpush3.bf16.msra.mxu0 %v1994_v42  ;;  %1968 = vmatprep.mubr.msk.f32.mxu0 %vm2153_vm0, %v2154_v4 }
 0x257   : > { %1996 = vmatprep.subr.bf16.mxu0 %v2152_v2  ;;  %1957 = vmatprep.mubr.msk.f32.mxu1 %vm2153_vm0, %v2154_v4 }
 0x258   : > { %1956 = vmatpush3.msra.mxu1 %v2451_v32 }
 0x259   : > { %1971 = vmatprep.subr.mxu1 %v2154_v4 }
 0x25a   : > { %1998 = vmatpush3.bf16.msra.mxu0 %v1997_v47 }
 0x25d   : > { %1969 = vmatmul.mubr.msk.f32.vlgmr.msra.gmra.mrb[12].mxu0 %vm560_vm2, %v2344_v28 }
 0x28a   : > { %v639_v53 = vpop.xlane.xlu0 %638 }
 0x28b   : > { %vm640_vm5 = vcmp.ge.f32.partialorder %v2369_v34, %v639_v53 }
 0x28c   : > { %v641_v2 = vsel %vm640_vm5, %v635_v57, 8  ;;  %vm1419_vm5 = vcmask 56320  }
 0x28d   : > { %v2434_v10 = vsel %vm636_vm3, %v641_v2, 2147483647  ;;  %v2466_v2 = vshrl.u32 %v634_v52, 7 }
 0x28e   : > { %v644_v20 = vshra.s32 %v2434_v10, 16 }
 0x290   : > { %v646_v28 = vcvt.s32.f32 %v644_v20 }
 0x2aa   : > { %v834_v49 = vpop.f32.mrb[2].mxu1 }
 0x2ab   : > { %v1919_v50 = vpop.f32.mrb[3].mxu1  ;;  %v838_v51 = vsel %vm636_vm3, %v834_v49, 0.0 }
 0x2ac   : > { %839 = vadd.xlane.f32.xlu1 %v838_v51  ;;  %v643_v51 = vand.u32 65535, %v2434_v10 }
 0x31c   : > { %v913_v54 = vpop.f32.mrb[4].mxu0 }
 0x31d   : > { %vm917_vm4 = vcmp.gt.f32.partialorder %v913_v54, %v834_v49  ;;  %v1924_v55 = vpop.f32.mrb[5].mxu0  ;;  %v920_v56 = vsel %vm636_vm3, %v913_v54, 0.0 }
 0x31e   : > { %v918_v58 = vsel %vm917_vm4, %v913_v54, %v834_v49  ;;  %921 = vadd.xlane.f32.xlu0 %v920_v56  ;;  %v919_v1 = vsel %vm917_vm4, 1, %v2158_v48  ;;  %vm1417_vm4 = vcmask 48128  }
 0x320   : > { %v994_v59 = vpop.f32.mrb[4].mxu1  ;;  %v1075_v60 = vpop.f32.mrb[6].mxu0 }
 0x321   : > { %vm998_vm6 = vcmp.gt.f32.partialorder %v994_v59, %v918_v58  ;;  %v1929_v61 = vpop.f32.mrb[5].mxu1  ;;  %v1934_v62 = vpop.f32.mrb[7].mxu0  ;;  %v1001_v63 = vsel %vm636_vm3, %v994_v59, 0.0  ;;  %v1082_v0 = vsel %vm636_vm3, %v1075_v60, 0.0 }
 0x322   : > { %v999_v3 = vsel %vm998_vm6, %v994_v59, %v918_v58  ;;  %1002 = vadd.xlane.f32.xlu0 %v1001_v63  ;;  %1083 = vadd.xlane.f32.xlu1 %v1082_v0  ;;  %v1000_v5 = vsel %vm998_vm6, 2, %v919_v1  ;;  %v645_v59 = vcvt.s32.f32 %v643_v51  ;;  %v464_v1 = vld [vmem:[%s462_s14] sm:$0xff] }
 0x323   : > { %vm1079_vm7 = vcmp.gt.f32.partialorder %v1075_v60, %v999_v3 }
 0x324   : > { %v1080_v6 = vsel %vm1079_vm7, %v1075_v60, %v999_v3  ;;  %v1155_v7 = vpop.f32.mrb[6].mxu1  ;;  %v1236_v8 = vpop.f32.mrb[8].mxu0  ;;  %v1081_v9 = vsel %vm1079_vm7, 3, %v1000_v5  ;;  %vm662_vm7 = vcmp.eq.s32.totalorder %v2466_v2, 0 }
 0x325   : > { %vm1159_vm8 = vcmp.gt.f32.partialorder %v1155_v7, %v1080_v6  ;;  %v1939_v11 = vpop.f32.mrb[7].mxu1  ;;  %v1944_v12 = vpop.f32.mrb[9].mxu0  ;;  %v1162_v13 = vsel %vm636_vm3, %v1155_v7, 0.0  ;;  %v1243_v14 = vsel %vm636_vm3, %v1236_v8, 0.0 }
 0x326   : > { %v1160_v15 = vsel %vm1159_vm8, %v1155_v7, %v1080_v6  ;;  %1163 = vadd.xlane.f32.xlu0 %v1162_v13  ;;  %1244 = vadd.xlane.f32.xlu1 %v1243_v14  ;;  %v1161_v16 = vsel %vm1159_vm8, 4, %v1081_v9 }
 0x327   : > { %vm1240_vm9 = vcmp.gt.f32.partialorder %v1236_v8, %v1160_v15 }
 0x328   : > { %v1241_v17 = vsel %vm1240_vm9, %v1236_v8, %v1160_v15  ;;  %v1317_v18 = vpop.f32.mrb[8].mxu1  ;;  %v1398_v19 = vpop.f32.mrb[10].mxu0  ;;  %v1242_v21 = vsel %vm1240_vm9, 5, %v1161_v16 }
 0x329   : > { %vm1321_vm10 = vcmp.gt.f32.partialorder %v1317_v18, %v1241_v17  ;;  %v1949_v22 = vpop.f32.mrb[9].mxu1  ;;  %v1954_v23 = vpop.f32.mrb[11].mxu0  ;;  %v1324_v24 = vsel %vm636_vm3, %v1317_v18, 0.0  ;;  %v1404_v25 = vsel %vm636_vm3, %v1398_v19, 0.0 }
 0x32a   : > { %v1322_v26 = vsel %vm1321_vm10, %v1317_v18, %v1241_v17  ;;  %1325 = vadd.xlane.f32.xlu0 %v1324_v24  ;;  %1405 = vadd.xlane.f32.xlu1 %v1404_v25  ;;  %v1323_v27 = vsel %vm1321_vm10, 6, %v1242_v21 }
 0x32b   : > { %vm1402_vm11 = vcmp.gt.f32.partialorder %v1398_v19, %v1322_v26  ;;  %v1591_v19 = vld [vmem:[%s2572_s11] sm:$0xff] }
 0x32c   : > { %v1403_v29 = vsel %vm1402_vm11, 7, %v1323_v27  ;;  %vm671_vm11 = vcmp.gt.s32.totalorder %v464_v1, 0 }
 0x32d   : > { %1694 = vst.msk [vmem:[%s2442_s22] sm:$0xff] %vm636_vm3, %v1403_v29 }
 0x32e   : > { %647 = vmin.xlane.f32.xlu0 %v646_v28 }
 0x330   : > { %v2446_v30 = vpop.f32.mrb[12].mxu0 }
 0x331   : > { %v1970_v31 = vpop.f32.mrb[13].mxu0 }
 0x339   : > { %v840_v33 = vpop.xlane.xlu1 %839 }
 0x33a   : > { %v842_v36 = vmul.f32 0.125, %v840_v33  ;;  %v1856_v33 = vld [vmem:[%s2570_s9] ss:$0 sm:$0xff] }
 0x3ab   : > { %v922_v34 = vpop.xlane.xlu0 %921 }
 0x3ac   : > { %v923_v35 = vmul.f32 0.125, %v922_v34 }
 0x3ae   : > { %v1408_v40 = vsel %vm675_vm12, %v842_v36, %v923_v35  ;;  %v1590_v36 = vld [vmem:[%s2571_s10] sm:$0xff] }
 0x3af   : > { %v1003_v37 = vpop.xlane.xlu0 %1002  ;;  %v1084_v38 = vpop.xlane.xlu1 %1083 }
 0x3b0   : > { %v1004_v39 = vmul.f32 0.125, %v1003_v37  ;;  %v1085_v41 = vmul.f32 0.125, %v1084_v38 }
 0x3b2   : > { %v1410_v42 = vsel %vm1409_vm13, %v1408_v40, %v1004_v39 }
 0x3b3   : > { %v1164_v43 = vpop.xlane.xlu0 %1163  ;;  %v1245_v44 = vpop.xlane.xlu1 %1244  ;;  %v1412_v46 = vsel %vm1411_vm14, %v1410_v42, %v1085_v41 }
 0x3b4   : > { %v1165_v45 = vmul.f32 0.125, %v1164_v43  ;;  %v1246_v47 = vmul.f32 0.125, %v1245_v44 }
 0x3b6   : > { %v1414_v48 = vsel %vm1413_vm15, %v1412_v46, %v1165_v45 }
 0x3b7   : > { %v1326_v49 = vpop.xlane.xlu0 %1325  ;;  %v1406_v50 = vpop.xlane.xlu1 %1405  ;;  %v1416_v55 = vsel %vm1415_vm1, %v1414_v48, %v1246_v47 }
 0x3b8   : > { %v1327_v53 = vmul.f32 0.125, %v1326_v49  ;;  %v1407_v54 = vmul.f32 0.125, %v1406_v50 }
 0x3ba   : > { %v1418_v56 = vsel %vm1417_vm4, %v1416_v55, %v1327_v53 }
 0x3bb   : > { %v1420_v57 = vsel %vm1419_vm5, %v1418_v56, %v1407_v54  ;;  %v648_v58 = vpop.xlane.xlu0 %647 }
 0x3bc   : > { %1958 = vmatmul.mubr.msk.f32.vlgmr.msra.gmra.mrb[10].mxu1 %vm636_vm3, %v1420_v57  ;;  %vm649_vm6 = vcmp.eq.f32.partialorder %v646_v28, %v648_v58  ;;  %v654_v61 = vcvt.f32.s32 %v648_v58 }
 0x3bd   : > { %v650_v60 = vsel %vm649_vm6, %v645_v59, inf  ;;  %1973 = vmatprep.mubr.msk.f32.mxu1 %vm2153_vm0, %v2154_v4 }
 0x3be   : > { %651 = vmin.xlane.f32.xlu1 %v650_v60  ;;  %v655_v63 = vshll.u32 %v654_v61, 16 }
 0x3cf   : > { %1594 = vperm.xlu1 %2051, %v1591_v19  }
 0x44b   : > { %v652_v62 = vpop.xlane.xlu1 %651 }
 0x44c   : > { %v653_v0 = vcvt.f32.s32 %v652_v62 }
 0x44e   : > { %v656_v3 = vadd.s32 %v655_v63, %v653_v0 }
 0x450   : > { %v657_v5 = vmul.u32 %v656_v3, %v464_v1 }
 0x452   : > { %vm658_vm8 = vcmp.eq.s32.totalorder %v657_v5, 0 }
 0x453   : > { %v659_v6 = vsel %vm658_vm8, 1, %v657_v5 }
 0x454   : > { %vm663_vm0 = vcmp.gt.s32.totalorder %v659_v6, 0  ;;  %v665_v7 = vand.u32 1, %v659_v6  ;;  %v668_v8 = vadd.s32 1, %v659_v6 }
 0x455   : > { %vm664_vm9 = vmand %vm662_vm7, %vm663_vm0 }
 0x456   : > { %vm666_vm10 = vcmp.eq.s32.totalorder %v665_v7, 0 }
 0x457   : > { %vm667_vm13 = vmand %vm664_vm9, %vm666_vm10 }
 0x458   : > { %v669_v9 = vsel %vm667_vm13, %v668_v8, %v659_v6 }
 0x459   : > { %vm670_vm14 = vcmp.gt.s32.totalorder %v669_v9, 1 }
 0x45a   : > { %vm672_vm15 = vmand %vm670_vm14, %vm671_vm11 }
 0x45b   : > { %v1836_v10 = vsel %vm672_vm15, 1.0, %v2154_v4  ;;  %v1421_v4 = vsel %vm560_vm2, %v2451_v32, 0.0 }
 0x45c   : > { %v676_v52 = vsel %vm675_vm12, %v1836_v10, 0.0  ;;  %v683_v17 = vmul.f32 0.125, %v1836_v10  ;;  %v1422_v22 = vrot.slane %v1421_v4, 4 }
 0x45d   : > { %v677_v11 = vrot.slane %v676_v52, 4 }
 0x45e   : > { %v1423_v23 = vadd.f32 %v1422_v22, %v1421_v4 }
 0x45f   : > { %v678_v12 = vadd.f32 %v677_v11, %v676_v52 }
 0x460   : > { %v1424_v24 = vrot.slane %v1423_v23, 2 }
 0x461   : > { %v679_v13 = vrot.slane %v678_v12, 2 }
 0x462   : > { %v1425_v25 = vadd.f32 %v1424_v24, %v1423_v23 }
 0x463   : > { %v680_v14 = vadd.f32 %v679_v13, %v678_v12 }
 0x464   : > { %v1426_v26 = vrot.slane %v1425_v25, 1 }
 0x465   : > { %v681_v15 = vrot.slane %v680_v14, 1 }
 0x466   : > { %v1427_v27 = vadd.f32 %v1426_v26, %v1425_v25 }
 0x467   : > { %v682_v16 = vadd.f32 %v681_v15, %v680_v14 }
 0x469   : > { %v684_v18 = vmul.f32 %v683_v17, %v682_v16 }
 0x46b   : > { %1430 = vperm.xlu0 %2050, %v684_v18  }
 0x48f   : > { %v1503_v20 = vpop.f32.mrb[10].mxu1 }
 0x490   : > { %v1959_v21 = vpop.f32.mrb[11].mxu1 }
 0x4ea   : > { %v1431_v28 = vpop.permute.xlu0 %1430 }
 0x4eb   : > { %v1433_v29 = vmul.f32 %v1431_v28, %v1427_v27 }
 0x4ed   : > { %v1504_v31 = vadd.f32 %v1503_v20, %v1433_v29 }
 0x4ef   : > { %v1578_v34 = vadd.f32 %v2446_v30, %v1504_v31 }
 0x4f1   : > { %v1588_v32 = vadd.f32 %v1856_v33, %v1578_v34 }
 0x4f3   : > { %2054 = vtanh.f32 %v1588_v32 }
 0x4fd   : > { %v2055_v35 = vpop.eup %2054 }
 0x4fe   : > { %1972 = vmatpush3.xpose.msk.msra.mxu1 %vm560_vm2, %v2055_v35 }
 0x501   : > { %1974 = vmatmul.mubr.msk.f32.vlgmr.msra.gmra.mrb[12].mxu1 %vm560_vm2, %v1590_v36 }
 0x502   : > { %2069 = shalt.err (!%p2066_p3)
}
 0x503   : > { %s2070_s22 = scalar_lea.hbm %s2490_s24, 128  ;;  %s2074_s17 = scalar_lea.hbm %s2574_s13, 256 }
 0x504   : > { %p2071_p4 = scmp.ne.s32.totalorder %s2490_s24, %s2070_s22  ;;  %p2075_p9 = scmp.lt.u32.totalorder %s2490_s24, %s2574_s13 }
 0x505   : > { %p2076_p10 = scmp.lt.u32.totalorder %s2074_s17, %s2070_s22  ;;  %p2078_p12 = scmp.lt.u32.totalorder %s2070_s22, %s2490_s24 }
 0x506   : > { %p2072_p7 = pnand %p2071_p4, %p2269_p5 }
 0x507   : > { %p2077_p11 = por %p2076_p10, %p2075_p9 }
 0x508   : > { %p2073_p8 = pneg %p2072_p7 }
 0x509   : > { %p2079_p13 = por %p2078_p12, %p2077_p11 }
 0x50b   : > { %p2080_p0 = pnand %p2079_p13, %p2073_p8 }
 0x50d   : > { %2083 = shalt.err (!%p2080_p0)
}
 0x50e   : > { %2000 = dma.vmem_to_hbm [thread:$0]  (%p2269_p5), %s1727_s27, 128, %s2490_s24, %s1700_s30   ;;  %v1595_v30 = vpop.permute.xlu1 %1594  ;;  %vm1692_vm4 = vcmask 57344  }
 0x50f   : > { %s1860_s27 = sshll.u32 %s2252_s29, 4  ;;  %s447_s24 = scalar_lea.vmem [#allocation2], %s2431_s20 }
 0x510   : > { %s1713_s30 = sshll.u32 %s447_s24, 4  ;;  %s2518_s21 = scalar_lea.hbm %s2573_s12, %s1860_s27  ;;  %s2520_s30 = int_to_ptr.vmem [resolvable:$true] %s1713_s30 }
 0x511   : > { %s1696_s22 = scalar_lea.sflag [#allocation3], %s2431_s20  ;;  %s2084_s2 = scalar_lea.vmem %s2520_s30, 16 }
 0x512   : > { %p2085_p1 = scmp.ne.s32.totalorder %s2520_s30, %s2084_s2  ;;  %s2160_s29 = smov [#allocation2]  }
 0x513   : > { %s2088_s23 = sshll.u32 %s2160_s29, 4  ;;  %s2089_s23 = int_to_ptr.vmem [resolvable:$false] %s2088_s23 }
 0x514   : > { %p2086_p2 = pnand %p2085_p1, %p2269_p5  ;;  %s2090_s17 = scalar_lea.vmem %s2089_s23, 32 }
 0x515   : > { %p2091_p4 = scmp.lt.s32.totalorder %s2520_s30, %s2089_s23  ;;  %p2092_p7 = scmp.lt.s32.totalorder %s2090_s17, %s2084_s2 }
 0x516   : > { %p2087_p3 = pneg %p2086_p2 }
 0x517   : > { %p2093_p8 = por %p2092_p7, %p2091_p4 }
 0x519   : > { %p2094_p9 = pnand %p2093_p8, %p2087_p3 }
 0x5d4   : > { %v1669_v37 = vpop.f32.mrb[12].mxu1 }
 0x5d5   : > { %v1670_v38 = vadd.f32 %v1669_v37, %v1595_v30  ;;  %v1975_v39 = vpop.f32.mrb[13].mxu1 }
 0x5d7   : > { %v1673_v40 = vsel %vm636_vm3, %v1670_v38, -inf }
 0x5d8   : > { %v1674_v41 = vrot.slane %v1673_v40, 4 }
 0x5da   : > { %v1675_v42 = vmax.f32 %v1673_v40, %v1674_v41 }
 0x5dc   : > { %v1676_v43 = vrot.slane %v1675_v42, 2 }
 0x5de   : > { %v1677_v44 = vmax.f32 %v1675_v42, %v1676_v43 }
 0x5e0   : > { %v1678_v45 = vrot.slane %v1677_v44, 1 }
 0x5e2   : > { %v1679_v46 = vmax.f32 %v1677_v44, %v1678_v45 }
 0x5e4   : > { %vm1680_vm2 = vcmp.ge.f32.partialorder %v1670_v38, %v1679_v46 }
 0x5e5   : > { %v1681_v47 = vsel %vm1680_vm2, %v2466_v2, 8 }
 0x5e6   : > { %v1682_v48 = vsel %vm636_vm3, %v1681_v47, 2147483647 }
 0x5e7   : > { %v1683_v49 = vrot.slane %v1682_v48, 4 }
 0x5e9   : > { %vm1684_vm12 = vcmp.lt.s32.totalorder %v1682_v48, %v1683_v49 }
 0x5ea   : > { %v1685_v50 = vsel %vm1684_vm12, %v1682_v48, %v1683_v49 }
 0x5eb   : > { %v1686_v51 = vrot.slane %v1685_v50, 2 }
 0x5ed   : > { %vm1687_vm1 = vcmp.lt.s32.totalorder %v1685_v50, %v1686_v51 }
 0x5ee   : > { %v1688_v53 = vsel %vm1687_vm1, %v1685_v50, %v1686_v51 }
 0x5ef   : > { %v1689_v54 = vrot.slane %v1688_v53, 1 }
 0x5f1   : > { %vm1690_vm5 = vcmp.lt.s32.totalorder %v1688_v53, %v1689_v54 }
 0x5f2   : > { %v1691_v55 = vsel %vm1690_vm5, %v1688_v53, %v1689_v54 }
 0x5f3   : > { %1693 = vst.msk [vmem:[%s447_s24] sm:$0x1] %vm1692_vm4, %v1691_v55 }
 0x5f4   : > { %2097 = shalt.err (!%p2094_p9)
}
 0x5f5   : > { %s2098_s20 = scalar_lea.hbm %s2518_s21, 16  ;;  %s2102_s27 = scalar_lea.hbm %s2573_s12, 32 }
 0x5f6   : > { %p2099_p10 = scmp.ne.s32.totalorder %s2518_s21, %s2098_s20  ;;  %p2103_p13 = scmp.lt.u32.totalorder %s2518_s21, %s2573_s12 }
 0x5f7   : > { %p2104_p0 = scmp.lt.u32.totalorder %s2102_s27, %s2098_s20  ;;  %p2106_p2 = scmp.lt.u32.totalorder %s2098_s20, %s2518_s21 }
 0x5f8   : > { %p2100_p11 = pnand %p2099_p10, %p2269_p5 }
 0x5f9   : > { %p2105_p1 = por %p2104_p0, %p2103_p13 }
 0x5fa   : > { %p2101_p12 = pneg %p2100_p11 }
 0x5fb   : > { %p2107_p3 = por %p2106_p2, %p2105_p1 }
 0x5fd   : > { %p2108_p4 = pnand %p2107_p3, %p2101_p12 }
 0x5ff   : > { %2111 = shalt.err (!%p2108_p4)
}
 0x600   : > { %1999 = dma.vmem_to_hbm [thread:$0]  (%p2269_p5), %s2520_s30, 16, %s2518_s21, %s1696_s22  }
 0x601 PF: > { %p2010_p7 = scmp.ge.s32.totalorder %s2150_s28, 2  ;;  %s1738_s16 = sand.u32 1, %s2138_s25  }
 0x602   : > { %s1739_s2 = scalar_lea.sflag [#allocation3], %s1738_s16 }
 0x603   : > { %p2004_p8 = pnand %p2010_p7, %p2273_p6 }
 0x605   : > { %2129 = dma.done.wait (!%p2004_p8), %s1739_s2, 16  }
 0x606   : > { %2131 = vsyncadd (!%p2004_p8), %s1739_s2, 4294967280  ;;  %s1747_s29 = scalar_lea.sflag [#allocation5], %s1738_s16 }
 0x607   : > { %2133 = dma.done.wait (!%p2004_p8), %s1747_s29, 128  }
 0x608   : > { %2135 = vsyncadd (!%p2004_p8), %s1747_s29, 4294967168  ;;  %s2587_s28 = sld [smem:[#allocation9_spill]]  ;;  %s2588_s18 = sld [smem:[#allocation8_spill]] }
 0x609   : > { %s2589_s27 = sld [smem:[#allocation10_spill]]  ;;  %s2590_s25 = smov %s2142_s26 }
 0x60e   : > { %p27_p5 = scmp.ge.s32.totalorder %s2587_s28, 4   ;;  %s2591_s26 = smov %s2588_s18 }
 0x610   :  { %29 = sbr.rel (!%p27_p5) target bundleno = 8 (0x8), region = 123 }
 0x617   :  { %1752 = vsyncpa [#allocation3], 1 }
 0x618   :  { %1754 = vsyncpa [#allocation3 + $0x1], 1 }
 0x619   :  { %1755 = vsyncpa [#allocation5], 1 }
 0x61a   :  { %1757 = vsyncpa [#allocation5 + $0x1], 1 }

</bundles_post_ra>
